<compile_context>
chip_gen: v6e
topology: v6e:2x2x1
jax: 0.10.0
libtpu: 0.0.40
codegen_flags: <defaults>
</compile_context>

<pallas_src>
import functools

import jax
import jax.numpy as jnp
from jax.experimental import pallas as pl
from jax.experimental.pallas import tpu as pltpu


LANES = 128
SUBLANES = 8
MAX_BLOCK_ROWS = 4096    # 4096 * 128 * 4 B = 2 MiB per f32 stream per buffer
NUM_CORES = 2            # leading "parallel" grid axis (v7x megacore)
NEG_BIG = float(jnp.finfo(jnp.float32).min)   # finite stand-in for -inf running max


def _round_up(x, m):
    return -(-x // m) * m


# ---------------------------------------------------------------------------
# Kernel factory (specialized on the call pattern / static geometry)
# ---------------------------------------------------------------------------
def _make_kernel(*, has_ldj, has_refp, has_lw, ignore_nan, batch,
                 block_rows, blocks_per_core, num_cores, num_blocks):
    n_inputs = 1 + int(has_ldj) + int(has_refp) + int(has_lw)
    sub = block_rows // SUBLANES
    block_elems = block_rows * LANES
    total_blocks = num_cores * blocks_per_core
    never_boundary = (batch == total_blocks * block_elems)
    always_boundary = (total_blocks == 1) and (batch < block_elems)

    def kernel(*refs):
        in_refs = refs[:n_inputs]
        out_refs = refs[n_inputs:]

        c = pl.program_id(0)
        j = pl.program_id(1)
        blk_id = c * blocks_per_core + j              # global (unclamped) block id

        # ---- per-core accumulator init (outputs double as accumulators) ----
        @pl.when(j == 0)
        def _init():
            if has_lw:
                m_ref, d_ref, s_ref = out_refs
                m_ref[...] = jnp.full((SUBLANES, LANES), NEG_BIG, jnp.float32)
                d_ref[...] = jnp.zeros((SUBLANES, LANES), jnp.float32)
                s_ref[...] = jnp.zeros((SUBLANES, LANES), jnp.float32)
            else:
                for r in out_refs:
                    r[...] = jnp.zeros((SUBLANES, LANES), jnp.float32)

        # ---- load, upcast to f32, fold to (sub, 8, 128) ---------------------
        idx = 0
        rw = in_refs[idx][...].astype(jnp.float32); idx += 1
        if has_ldj:
            rw = rw - in_refs[idx][...].astype(jnp.float32); idx += 1
        if has_refp:
            rw = rw - in_refs[idx][...].astype(jnp.float32); idx += 1
        rw3 = rw.reshape(sub, SUBLANES, LANES)
        if has_lw:
            lw3 = in_refs[idx][...].astype(jnp.float32).reshape(sub, SUBLANES, LANES)

        def accumulate(valid3):
            """valid3: None (fully valid block) or (sub, 8, 128) bool mask."""
            if has_lw:
                m_ref, d_ref, s_ref = out_refs
                lw_m = lw3 if valid3 is None else jnp.where(valid3, lw3, -jnp.inf)
                m_old = m_ref[...]
                m_new = jnp.maximum(m_old, jnp.max(lw_m, axis=0))   # VPU vreg maxes
                corr = jnp.exp(m_old - m_new)                       # EUP; m_old finite
                e3 = jnp.exp(lw_m - m_new[None])                    # masked -> exp(-inf)=0
                p3 = e3 * rw3
                if valid3 is not None:
                    p3 = jnp.where(valid3, p3, 0.0)   # OOB garbage (maybe NaN) -> 0
                if ignore_nan:
                    p3 = jnp.where(jnp.isnan(p3), 0.0, p3)
                d_ref[...] = corr * d_ref[...] + jnp.sum(e3, axis=0)
                s_ref[...] = corr * s_ref[...] + jnp.sum(p3, axis=0)
                m_ref[...] = m_new
            elif ignore_nan:
                s_ref, cnt_ref = out_refs
                ok = jnp.logical_not(jnp.isnan(rw3))
                if valid3 is not None:
                    ok = jnp.logical_and(ok, valid3)
                s_ref[...] = s_ref[...] + jnp.sum(jnp.where(ok, rw3, 0.0), axis=0)
                cnt_ref[...] = cnt_ref[...] + jnp.sum(ok.astype(jnp.float32), axis=0)
            else:
                (s_ref,) = out_refs
                contrib = rw3 if valid3 is None else jnp.where(valid3, rw3, 0.0)
                s_ref[...] = s_ref[...] + jnp.sum(contrib, axis=0)  # NaNs propagate

        def masked_accumulate():
            r_ids = jax.lax.broadcasted_iota(jnp.int32, (sub, SUBLANES, LANES), 0)
            s_ids = jax.lax.broadcasted_iota(jnp.int32, (sub, SUBLANES, LANES), 1)
            l_ids = jax.lax.broadcasted_iota(jnp.int32, (sub, SUBLANES, LANES), 2)
            gidx = blk_id * block_elems + (r_ids * SUBLANES + s_ids) * LANES + l_ids
            accumulate(gidx < batch)

        if never_boundary:
            accumulate(None)
        elif always_boundary:
            masked_accumulate()
        else:
            # fully-valid fast path: only boundary / duplicated blocks build a mask
            is_boundary = (blk_id + 1) * block_elems > batch

            @pl.when(jnp.logical_not(is_boundary))
            def _full():
                accumulate(None)

            @pl.when(is_boundary)
            def _edge():
                masked_accumulate()

    return kernel


# ---------------------------------------------------------------------------
# Jitted runner (host prep + pallas_call + tiny merge, all fused)
# ---------------------------------------------------------------------------
@functools.partial(jax.jit, static_argnums=(0,))
def _run(config, *arrays):
    (batch, rows_p, block_rows, num_cores, blocks_per_core, num_blocks,
     has_ldj, has_refp, has_lw, ignore_nan, vmem_limit, input_buffers) = config

    padded = rows_p * LANES
    tiles = []
    for x in arrays:
        x = x.reshape(-1)
        if (not jnp.issubdtype(x.dtype, jnp.floating)) or x.dtype.itemsize > 4:
            x = x.astype(jnp.float32)
        if x.shape[0] != padded:
            x = jnp.pad(x, (0, padded - x.shape[0]))
        tiles.append(x.reshape(rows_p, LANES))

    kernel = _make_kernel(
        has_ldj=has_ldj, has_refp=has_refp, has_lw=has_lw, ignore_nan=ignore_nan,
        batch=batch, block_rows=block_rows, blocks_per_core=blocks_per_core,
        num_cores=num_cores, num_blocks=num_blocks)

    if num_cores * blocks_per_core == num_blocks:
        def in_map(c, j):
            return (c * blocks_per_core + j, 0)
    else:
        last_blk = num_blocks - 1

        def in_map(c, j):   # odd block count: duplicate (fully masked) last block
            return (jnp.minimum(c * blocks_per_core + j, last_blk), 0)

    spec_kwargs = {}
    if input_buffers > 2:   # optional deeper pipelining (v7x)
        spec_kwargs["pipeline_mode"] = pl.Buffered(int(input_buffers))
    in_spec = pl.BlockSpec((block_rows, LANES), in_map, **spec_kwargs)

    n_out = 3 if has_lw else (2 if ignore_nan else 1)
    out_spec = pl.BlockSpec((None, SUBLANES, LANES), lambda c, j: (c, 0, 0))
    out_shape = tuple(jax.ShapeDtypeStruct((num_cores, SUBLANES, LANES), jnp.float32)
                      for _ in range(n_out))

    grid_spec = pltpu.PrefetchScalarGridSpec(
        num_scalar_prefetch=0,
        grid=(num_cores, blocks_per_core),
        in_specs=[in_spec] * len(tiles),
        out_specs=[out_spec] * n_out,
    )

    outs = pl.pallas_call(
        kernel,
        out_shape=out_shape,
        grid_spec=grid_spec,
        compiler_params=pltpu.CompilerParams(
            dimension_semantics=("parallel", "arbitrary"),
            vmem_limit_bytes=vmem_limit),
    )(*tiles)

    # ---- tiny cross-core / cross-position merge (plain XLA) ----------------
    if has_lw:
        m, d, s = (o.reshape(-1) for o in outs)
        m_max = jnp.max(m)
        scale = jnp.exp(m - m_max)     # never-touched positions: exp(NEG_BIG - m) = 0
        return jnp.sum(s * scale) / jnp.sum(d * scale)
    if ignore_nan:
        s, cnt = outs
        return jnp.sum(s) / jnp.sum(cnt)
    (s,) = outs
    return jnp.sum(s) / float(batch)


# ---------------------------------------------------------------------------
# Public wrapper
# ---------------------------------------------------------------------------
def boltzmann_kl_div_loss(target_potentials, log_det_J=None, log_weights=None,
                          ref_potentials=None, ignore_nan=False,
                          max_block_rows=MAX_BLOCK_ROWS, input_buffers=2):
    """Pallas TPU implementation of BoltzmannKLDivLoss.forward."""
    raw = [target_potentials]
    has_ldj = log_det_J is not None
    has_refp = ref_potentials is not None
    has_lw = log_weights is not None
    if has_ldj:
        raw.append(log_det_J)
    if has_refp:
        raw.append(ref_potentials)
    if has_lw:
        raw.append(log_weights)

    arrs, itemsizes = [], []
    for x in raw:
        x = jnp.asarray(x)
        streamed = jnp.issubdtype(x.dtype, jnp.floating) and x.dtype.itemsize <= 4
        itemsizes.append(x.dtype.itemsize if streamed else 4)  # non-float -> cast f32
        arrs.append(x)

    batch = int(arrs[0].size)
    if batch < 1:
        raise ValueError("BoltzmannKLDivLoss requires a non-empty batch.")

    # sublane-tile multiple: 8 rows for f32, 16 for bf16/f16, 32 for 8-bit floats
    row_mult = max(SUBLANES * (4 // its) for its in itemsizes)
    rows_needed = -(-batch // LANES)
    rows_p = _round_up(rows_needed, row_mult)
    max_rows = max(row_mult, (int(max_block_rows) // row_mult) * row_mult)
    block_rows = min(rows_p, max_rows)
    num_blocks = -(-rows_p // block_rows)
    num_cores = NUM_CORES if num_blocks >= NUM_CORES else 1
    blocks_per_core = -(-num_blocks // num_cores)

    bufs = max(2, int(input_buffers))
    need = bufs * block_rows * LANES * sum(itemsizes)
    vmem_limit = int(min(100 << 20, max(32 << 20, need + (8 << 20))))

    config = (batch, rows_p, block_rows, num_cores, blocks_per_core, num_blocks,
              has_ldj, has_refp, has_lw, bool(ignore_nan), vmem_limit,
              int(input_buffers))
    return _run(config, *arrs)


# ---------------------------------------------------------------------------
# Pure-JAX reference (mirrors the PyTorch module)
# ---------------------------------------------------------------------------
def _reference(target_potentials, log_det_J=None, log_weights=None,
               ref_potentials=None, ignore_nan=False):
    f32 = lambda x: jnp.asarray(x, jnp.float32)
    rw = f32(target_potentials)
    if log_det_J is not None:
        rw = rw - f32(log_det_J)
    if ref_potentials is not None:
        rw = rw - f32(ref_potentials)
    if log_weights is not None:
        w = jax.nn.softmax(f32(log_weights))
        prod = w * rw
        if ignore_nan:
            prod = jnp.where(jnp.isnan(prod), 0.0, prod)
        return jnp.sum(prod)
    if ignore_nan:
        ok = jnp.logical_not(jnp.isnan(rw))
        return jnp.sum(jnp.where(ok, rw, 0.0)) / jnp.sum(ok.astype(jnp.float32))
    return jnp.mean(rw)


# ---------------------------------------------------------------------------
# Main
# ---------------------------------------------------------------------------
if __name__ == "__main__":
    key = jax.random.PRNGKey(0)
    k1, k2, k3, k4 = jax.random.split(key, 4)

    # small single-block cases (batch = 8)
    batch = 8
    target = jax.random.normal(k1, (batch,), jnp.float32) * 3.0 + 10.0
    log_det_J = jax.random.normal(k2, (batch,), jnp.float32)
    log_weights = jax.random.normal(k3, (batch,), jnp.float32)
    ref_pot = jax.random.normal(k4, (batch,), jnp.float32) * 2.0 + 5.0
    target_nan = target.at[3].set(jnp.nan)

    cases = [
        (dict(target_potentials=target), {}),
        (dict(target_potentials=target, log_det_J=log_det_J,
              ref_potentials=ref_pot), {}),
        (dict(target_potentials=target, log_det_J=log_det_J,
              log_weights=log_weights, ref_potentials=ref_pot), {}),
        (dict(target_potentials=target_nan, log_det_J=log_det_J,
              ignore_nan=True), {}),
        (dict(target_potentials=target_nan, log_det_J=log_det_J,
              log_weights=log_weights, ignore_nan=True), {}),
    ]

    # multi-block cases with a tiny tile: exercises the 2-core grid, the
    # ragged boundary block (4000), a duplicated out-of-range block (3000),
    # and the exact-fit mask-free fast path (2048); plus the default big tile.
    kb1, kb2, kb3 = jax.random.split(jax.random.PRNGKey(1), 3)
    for big in (4000, 3000, 2048):
        t_big = jax.random.normal(kb1, (big,), jnp.float32) * 2.0 + 3.0
        ldj_big = jax.random.normal(kb2, (big,), jnp.float32)
        lw_big = jax.random.normal(kb3, (big,), jnp.float32)
        t_big_nan = t_big.at[100].set(jnp.nan)
        cases += [
            (dict(target_potentials=t_big, log_det_J=ldj_big),
             dict(max_block_rows=8)),
            (dict(target_potentials=t_big, log_det_J=ldj_big,
                  log_weights=lw_big), dict(max_block_rows=8)),
            (dict(target_potentials=t_big_nan, log_det_J=ldj_big,
                  ignore_nan=True), dict(max_block_rows=8)),
            (dict(target_potentials=t_big_nan, log_det_J=ldj_big,
                  log_weights=lw_big, ignore_nan=True), dict(max_block_rows=8)),
            (dict(target_potentials=t_big, log_det_J=ldj_big,
                  log_weights=lw_big), {}),
        ]

    # native bf16 streaming (multi-block weighted + single-block mean)
    kc1, kc2, kc3 = jax.random.split(jax.random.PRNGKey(2), 3)
    t_bf = (jax.random.normal(kc1, (5000,), jnp.float32) * 2.0 + 3.0).astype(jnp.bfloat16)
    l_bf = jax.random.normal(kc2, (5000,), jnp.float32).astype(jnp.bfloat16)
    w_bf = jax.random.normal(kc3, (5000,), jnp.float32).astype(jnp.bfloat16)
    cases += [
        (dict(target_potentials=t_bf, log_det_J=l_bf, log_weights=w_bf),
         dict(max_block_rows=16)),
        (dict(target_potentials=t_bf, log_det_J=l_bf), {}),
    ]

    for kwargs, extra in cases:
        got = jax.block_until_ready(boltzmann_kl_div_loss(**kwargs, **extra))
        want = jax.block_until_ready(_reference(**kwargs))
        assert jnp.allclose(got, want, rtol=1e-4, atol=1e-5), (got, want, kwargs, extra)

    print("KERNEL_OK")
</pallas_src>

<mosaic_0001>
module attributes {stable_mosaic.version = 11 : i64} {
  func.func @kernel(%arg0: i32, %arg1: i32, %arg2: memref<8x128xf32, #tpu.memory_space<vmem>>, %arg3: memref<1x8x128xf32, #tpu.memory_space<vmem>>) attributes {dimension_semantics = [#tpu.dimension_semantics<parallel>, #tpu.dimension_semantics<arbitrary>], iteration_bounds = array<i64: 1, 1>, scalar_prefetch = 0 : i64, scratch_operands = 0 : i64, tpu.core_type = #tpu.core_type<tc>, window_params = [{transform_indices = @transform_0, window_bounds = array<i64: 8, 128>}, {transform_indices = @transform_1, window_bounds = array<i64: 1, 8, 128>}]} {
    %c1_i32 = arith.constant 1 : i32
    %0 = arith.muli %arg0, %c1_i32 : i32
    %1 = arith.addi %0, %arg1 : i32
    %c0_i32 = arith.constant 0 : i32
    %2 = arith.cmpi eq, %arg1, %c0_i32 : i32
    %3 = arith.extui %2 : i1 to i32
    %c0_i32_0 = arith.constant 0 : i32
    %4 = arith.cmpi ne, %3, %c0_i32_0 : i32
    scf.if %4 {
      %cst_10 = arith.constant 0.000000e+00 : f32
      %30 = vector.broadcast %cst_10 : f32 to vector<8x128xf32>
      %c0_11 = arith.constant 0 : index
      %c0_12 = arith.constant 0 : index
      %c0_13 = arith.constant 0 : index
      %31 = vector.load %arg3[%c0_11, %c0_12, %c0_13] : memref<1x8x128xf32, #tpu.memory_space<vmem>>, vector<1x8x128xf32>
      %32 = vector.shape_cast %31 : vector<1x8x128xf32> to vector<8x128xf32>
      %33 = vector.shape_cast %30 : vector<8x128xf32> to vector<1x8x128xf32>
      tpu.vector_store %arg3[%c0_11, %c0_12, %c0_13], %33 {strides = array<i32>} : memref<1x8x128xf32, #tpu.memory_space<vmem>>, vector<1x8x128xf32>,
    } else {
    }
    %c0 = arith.constant 0 : index
    %c0_1 = arith.constant 0 : index
    %5 = vector.load %arg2[%c0, %c0_1] : memref<8x128xf32, #tpu.memory_space<vmem>>, vector<8x128xf32>
    %6 = vector.shape_cast %5 : vector<8x128xf32> to vector<1x8x128xf32>
    %7 = tpu.iota {dimensions = array<i32: 0>} : vector<1x8x128xi32>
    %8 = tpu.iota {dimensions = array<i32: 1>} : vector<1x8x128xi32>
    %9 = tpu.iota {dimensions = array<i32: 2>} : vector<1x8x128xi32>
    %c1024_i32 = arith.constant 1024 : i32
    %10 = arith.muli %1, %c1024_i32 : i32
    %c8_i32 = arith.constant 8 : i32
    %11 = vector.broadcast %c8_i32 : i32 to vector<1x8x128xi32>
    %12 = arith.muli %7, %11 : vector<1x8x128xi32>
    %13 = arith.addi %12, %8 : vector<1x8x128xi32>
    %c128_i32 = arith.constant 128 : i32
    %14 = vector.broadcast %c128_i32 : i32 to vector<1x8x128xi32>
    %15 = arith.muli %13, %14 : vector<1x8x128xi32>
    %16 = vector.broadcast %10 : i32 to vector<1x8x128xi32>
    %17 = arith.addi %16, %15 : vector<1x8x128xi32>
    %18 = arith.addi %17, %9 : vector<1x8x128xi32>
    %c8_i32_2 = arith.constant 8 : i32
    %19 = vector.broadcast %c8_i32_2 : i32 to vector<1x8x128xi32>
    %20 = arith.cmpi slt, %18, %19 : vector<1x8x128xi32>
    %cst = arith.constant 0.000000e+00 : f32
    %21 = vector.broadcast %cst : f32 to vector<1x8x128xf32>
    %22 = arith.select %20, %6, %21 : vector<1x8x128xi1>, vector<1x8x128xf32>
    %c0_3 = arith.constant 0 : index
    %c0_4 = arith.constant 0 : index
    %c0_5 = arith.constant 0 : index
    %23 = vector.load %arg3[%c0_3, %c0_4, %c0_5] : memref<1x8x128xf32, #tpu.memory_space<vmem>>, vector<1x8x128xf32>
    %24 = vector.shape_cast %23 : vector<1x8x128xf32> to vector<8x128xf32>
    %cst_6 = arith.constant dense<0.000000e+00> : vector<8x128xf32>
    %25 = vector.multi_reduction <add>, %22, %cst_6 [0] : vector<1x8x128xf32> to vector<8x128xf32>
    %26 = arith.addf %24, %25 : vector<8x128xf32>
    %c0_7 = arith.constant 0 : index
    %c0_8 = arith.constant 0 : index
    %c0_9 = arith.constant 0 : index
    %27 = vector.load %arg3[%c0_7, %c0_8, %c0_9] : memref<1x8x128xf32, #tpu.memory_space<vmem>>, vector<1x8x128xf32>
    %28 = vector.shape_cast %27 : vector<1x8x128xf32> to vector<8x128xf32>
    %29 = vector.shape_cast %26 : vector<8x128xf32> to vector<1x8x128xf32>
    tpu.vector_store %arg3[%c0_7, %c0_8, %c0_9], %29 {strides = array<i32>} : memref<1x8x128xf32, #tpu.memory_space<vmem>>, vector<1x8x128xf32>,
    return
  }
  func.func @transform_0(%arg0: i32, %arg1: i32) -> (i32, i32) {
    %c1_i32 = arith.constant 1 : i32
    %0 = arith.muli %arg0, %c1_i32 : i32
    %1 = arith.addi %0, %arg1 : i32
    %c0_i32 = arith.constant 0 : i32
    %c0_i32_0 = arith.constant 0 : i32
    return %1, %c0_i32 : i32, i32
  }
  func.func @transform_1(%arg0: i32, %arg1: i32) -> (i32, i32, i32) {
    %c0_i32 = arith.constant 0 : i32
    %c0_i32_0 = arith.constant 0 : i32
    %c0_i32_1 = arith.constant 0 : i32
    return %arg0, %c0_i32, %c0_i32_0 : i32, i32, i32
  }
}

</mosaic_0001>

<bundles_post_ra>
// kernel: _run.1
= control target key start
LH: loop header
LB: loop body
LE: loop exit
PB: predicated region body
PF: predicated region fallthrough
CT: control target
= control target key end

     0   :  { %v32_v0 = vlaneseq  ;;  %s74_s0 = inlined_call_operand.vmem [shape: f32[8,128], index: 0, kind: input, shape index: {}]   ;;  %s75_s1 = inlined_call_operand.vmem [shape: f32[1,8,128], index: 1, kind: output, shape index: {}]  }
   0x1   :  { %v31_v4 = vld [vmem:[%s74_s0] sm:$0xff] }
   0x2   :  { %v33_v1 = vshrl.u32 %v32_v0, 7  ;;  %v35_v2 = vand.u32 127, %v32_v0 }
   0x4   :  { %v37_v3 = vmul.u32 128, %v33_v1 }
   0x6   :  { %v40_v5 = vadd.s32 %v37_v3, %v35_v2 }
   0x8   :  { %vm41_vm0 = vcmp.lt.s32.totalorder %v40_v5, 8 }
   0x9   :  { %v42_v6 = vsel %vm41_vm0, %v31_v4, 0.0 }
   0xa   :  { %46 = vst [vmem:[%s75_s1] sm:$0xff] %v42_v6 }

</bundles_post_ra>
